<compile_context>
chip_gen: v6e
topology: v6e:2x2x1
jax: 0.10.0
libtpu: 0.0.40
codegen_flags: <defaults>
</compile_context>

<pallas_src>
import jax
import jax.numpy as jnp
from jax import lax
from jax.experimental import pallas as pl
from jax.experimental.pallas import tpu as pltpu


def _round_up(x: int, m: int) -> int:
    return ((x + m - 1) // m) * m


def _pick_vmem_limit() -> int:
    """~75% of physical VMEM, capped at 96 MiB (v5e/v6e: 96 MiB, v7x: 48 MiB)."""
    try:
        cap = int(pltpu.get_tpu_info().vmem_capacity_bytes)
    except Exception:
        cap = 64 * 1024 * 1024
    return min((cap * 3) // 4, 96 * 1024 * 1024)


def _const_spec(shape, single_buffer):
    """Constant (grid-invariant) operand spec; single-buffered when large."""
    if single_buffer:
        try:
            return pl.BlockSpec(shape, lambda bi, vi: (0, 0),
                                pipeline_mode=pl.Buffered(1))
        except TypeError:  # older JAX without pipeline_mode kwarg
            pass
    return pl.BlockSpec(shape, lambda bi, vi: (0, 0))


def _embedding_bag_mlp_kernel(idx_ref,   # VMEM (S, TILE_B, 1)     int32
                              emb_ref,   # VMEM (TILE_V, D)        bf16
                              w1_ref,    # VMEM (D, Hp)            f32
                              b1_ref,    # VMEM (1, Hp)            f32
                              w2_ref,    # VMEM (Hp, Op)           f32
                              b2_ref,    # VMEM (1, Op)            f32
                              o_ref,     # VMEM (TILE_B, Op)       f32
                              acc_ref):  # VMEM scratch (S*TILE_B, D) f32
    vi = pl.program_id(1)
    nv = pl.num_programs(1)
    seq, tile_b, _ = idx_ref.shape
    tile_v, d = emb_ref.shape
    bs = seq * tile_b

    @pl.when(vi == 0)
    def _init():
        acc_ref[...] = jnp.zeros_like(acc_ref)

    # --- EmbeddingBag(mode='mean'), count-matmul formulation --------------------
    # One broadcasted compare builds the whole one-hot; the per-token sum is done
    # on the MXU instead of a per-token VPU loop.  Shift idx by the tile offset so
    # the iota is grid-step independent.
    idx_flat = idx_ref[...].reshape(bs, 1) - vi * tile_v            # (S*TILE_B, 1)
    v_iota = lax.broadcasted_iota(jnp.int32, (bs, tile_v), 1)
    onehot = (v_iota == idx_flat).astype(jnp.bfloat16)              # (S*TILE_B, TILE_V)

    # bf16 x bf16 -> f32 accumulate on the MXU.  Padded / out-of-range vocab ids
    # never match the iota, so they contribute exactly zero.
    acc_ref[...] += jnp.dot(onehot, emb_ref[...],
                            preferred_element_type=jnp.float32)

    # --- last vocab tile: mean, dropout(=identity), MLP, sigmoid ----------------
    @pl.when(vi == nv - 1)
    def _finish():
        # Row r = s*TILE_B + b  ->  free split into (S, TILE_B, D), sum over S.
        pooled = acc_ref[...].reshape(seq, tile_b, d).sum(axis=0)
        pooled = pooled * jnp.float32(1.0 / seq)                    # fixed bag length
        h = jnp.dot(pooled, w1_ref[...],
                    preferred_element_type=jnp.float32) + b1_ref[...]
        h = jnp.maximum(h, 0.0)
        out = jnp.dot(h, w2_ref[...],
                      preferred_element_type=jnp.float32) + b2_ref[...]
        o_ref[...] = jax.nn.sigmoid(out).astype(o_ref.dtype)


def embedding_bag_model(indices, emb_table, w1, b1, w2, b2,
                        *, tile_b=None, tile_v=None, vmem_limit_bytes=None):
    """indices: (B, S) int; weights stored as (in, out); returns (B, O) float32."""
    B, S = indices.shape
    V, D = emb_table.shape
    H = w1.shape[1]
    O = w2.shape[1]

    # --- tile sizes / padded shapes ---------------------------------------------
    if tile_b is None:
        tile_b = 128 if B >= 128 else _round_up(B, 8)
    Bp = _round_up(B, tile_b)
    # Ensure >=2 batch grid steps (when splittable) so v7x megacore engages.
    if Bp // tile_b < 2 and Bp >= 16 and (Bp // 2) % 8 == 0:
        tile_b = Bp // 2

    if tile_v is None:
        if V <= 128:
            tile_v = _round_up(V, 8)            # single vocab step, block == full dim
        else:
            bs = tile_b * S
            cap_onehot = max(128, (4 * 1024 * 1024) // (2 * bs))   # one-hot temp <= ~4 MiB
            cap_slab = max(128, (2 * 1024 * 1024) // (2 * D))      # emb slab <= ~2 MiB/buffer
            tile_v = min(_round_up(V, 128), cap_onehot, cap_slab)
            tile_v = max(128, (tile_v // 128) * 128)
    Vp = _round_up(V, tile_v)

    Hp = _round_up(H, 128)   # lane-dense hidden dim
    Op = _round_up(O, 128)   # lane-dense output -> unmasked final store

    if vmem_limit_bytes is None:
        vmem_limit_bytes = _pick_vmem_limit()

    # --- operand prep (kept minimal: no padded f32 table copy) -------------------
    # Tokens flattened s-major: idx_in[s, b, 0] = indices[b, s].
    idx_t = jnp.transpose(indices.astype(jnp.int32))                 # (S, B)
    if Bp != B:
        idx_t = jnp.zeros((S, Bp), jnp.int32).at[:, :B].set(idx_t)
    idx_in = idx_t.reshape(S, Bp, 1)

    emb = emb_table if emb_table.dtype == jnp.bfloat16 else emb_table.astype(jnp.bfloat16)
    if Vp != V:
        emb = jnp.zeros((Vp, D), jnp.bfloat16).at[:V].set(emb)

    w1_p = jnp.zeros((D, Hp), jnp.float32).at[:, :H].set(w1.astype(jnp.float32))
    b1_p = jnp.zeros((1, Hp), jnp.float32).at[:, :H].set(jnp.reshape(b1, (1, H)).astype(jnp.float32))
    w2_p = jnp.zeros((Hp, Op), jnp.float32).at[:H, :O].set(w2.astype(jnp.float32))
    b2_p = jnp.zeros((1, Op), jnp.float32).at[:, :O].set(jnp.reshape(b2, (1, O)).astype(jnp.float32))

    # Single-buffer the constant MLP weights only when they are big enough to matter.
    single_buffer = (D * Hp + Hp * Op) * 4 > (2 << 20)

    grid = (Bp // tile_b, Vp // tile_v)   # batch parallel, vocab reduction (last)

    out_p = pl.pallas_call(
        _embedding_bag_mlp_kernel,
        out_shape=jax.ShapeDtypeStruct((Bp, Op), jnp.float32),
        grid_spec=pltpu.PrefetchScalarGridSpec(
            num_scalar_prefetch=0,
            grid=grid,
            in_specs=[
                pl.BlockSpec((S, tile_b, 1), lambda bi, vi: (0, bi, 0)),   # token ids
                pl.BlockSpec((tile_v, D),    lambda bi, vi: (vi, 0)),      # emb slab (bf16)
                _const_spec((D, Hp), single_buffer),                       # w1
                _const_spec((1, Hp), single_buffer),                       # b1
                _const_spec((Hp, Op), single_buffer),                      # w2
                _const_spec((1, Op), single_buffer),                       # b2
            ],
            out_specs=pl.BlockSpec((tile_b, Op), lambda bi, vi: (bi, 0)),
            scratch_shapes=[pltpu.VMEM((S * tile_b, D), jnp.float32)],     # bag-sum acc
        ),
        compiler_params=pltpu.CompilerParams(
            dimension_semantics=("parallel", "arbitrary"),
            vmem_limit_bytes=vmem_limit_bytes,
        ),
    )(idx_in, emb, w1_p, b1_p, w2_p, b2_p)

    return out_p[:B, :O]


def reference(indices, emb_table, w1, b1, w2, b2):
    tbl = emb_table.astype(jnp.float32)
    pooled = jnp.mean(tbl[indices], axis=1)                  # (B, D)
    h = jnp.maximum(pooled @ w1 + b1, 0.0)
    return jax.nn.sigmoid(h @ w2 + b2)


if __name__ == "__main__":
    # Small deterministic config (matches the module's constructor args).
    vocab_size, embedding_dim, hidden_size, output_size = 64, 32, 32, 8
    batch, seq = 4, 8

    key = jax.random.PRNGKey(0)
    k_idx, k_emb, k_w1, k_b1, k_w2, k_b2 = jax.random.split(key, 6)

    indices = jax.random.randint(k_idx, (batch, seq), 0, vocab_size, dtype=jnp.int32)

    # Embedding table kept in bf16: the kernel streams it as-is (no wrapper copy).
    emb_table = jax.random.normal(k_emb, (vocab_size, embedding_dim),
                                  jnp.float32).astype(jnp.bfloat16)
    lim1 = 1.0 / float(embedding_dim) ** 0.5
    w1 = jax.random.uniform(k_w1, (embedding_dim, hidden_size), jnp.float32, -lim1, lim1)
    b1 = jax.random.uniform(k_b1, (1, hidden_size), jnp.float32, -lim1, lim1)
    lim2 = 1.0 / float(hidden_size) ** 0.5
    w2 = jax.random.uniform(k_w2, (hidden_size, output_size), jnp.float32, -lim2, lim2)
    b2 = jax.random.uniform(k_b2, (1, output_size), jnp.float32, -lim2, lim2)

    out = embedding_bag_model(indices, emb_table, w1, b1, w2, b2)
    out = jax.block_until_ready(out)

    ref = reference(indices, emb_table, w1, b1, w2, b2)
    assert out.shape == (batch, output_size)
    # Same bf16 table values in both paths; remaining delta is f32 accumulation
    # order (count-matmul vs gather+mean) and MXU f32 matmul decomposition.
    assert jnp.allclose(out, ref, atol=2e-3, rtol=2e-3), "mismatch vs pure-JAX reference"

    print("KERNEL_OK")
</pallas_src>

<mosaic_0001>
module attributes {stable_mosaic.version = 11 : i64} {
  func.func @_embedding_bag_mlp_kernel(%arg0: i32, %arg1: i32, %arg2: memref<8x8x1xi32, #tpu.memory_space<vmem>>, %arg3: memref<64x32xbf16, #tpu.memory_space<vmem>>, %arg4: memref<32x128xf32, #tpu.memory_space<vmem>>, %arg5: memref<1x128xf32, #tpu.memory_space<vmem>>, %arg6: memref<128x128xf32, #tpu.memory_space<vmem>>, %arg7: memref<1x128xf32, #tpu.memory_space<vmem>>, %arg8: memref<8x128xf32, #tpu.memory_space<vmem>>, %arg9: memref<64x32xf32, #tpu.memory_space<vmem>>) attributes {dimension_semantics = [#tpu.dimension_semantics<parallel>, #tpu.dimension_semantics<arbitrary>], iteration_bounds = array<i64: 1, 1>, scalar_prefetch = 0 : i64, scratch_operands = 1 : i64, tpu.core_type = #tpu.core_type<tc>, window_params = [{transform_indices = @transform_0, window_bounds = array<i64: 8, 8, 1>}, {transform_indices = @transform_1, window_bounds = array<i64: 64, 32>}, {pipeline_mode = #tpu.pipeline_mode<synchronous>, transform_indices = @transform_2, window_bounds = array<i64: 32, 128>}, {pipeline_mode = #tpu.pipeline_mode<synchronous>, transform_indices = @transform_3, window_bounds = array<i64: 1, 128>}, {pipeline_mode = #tpu.pipeline_mode<synchronous>, transform_indices = @transform_4, window_bounds = array<i64: 128, 128>}, {pipeline_mode = #tpu.pipeline_mode<synchronous>, transform_indices = @transform_5, window_bounds = array<i64: 1, 128>}, {transform_indices = @transform_6, window_bounds = array<i64: 8, 128>}]} {
    %c0_i32 = arith.constant 0 : i32
    %0 = arith.cmpi eq, %arg1, %c0_i32 : i32
    %1 = arith.extui %0 : i1 to i32
    %c0_i32_0 = arith.constant 0 : i32
    %2 = arith.cmpi ne, %1, %c0_i32_0 : i32
    scf.if %2 {
      %cst_11 = arith.constant 0.000000e+00 : f32
      %22 = vector.broadcast %cst_11 : f32 to vector<64x32xf32>
      %c0_12 = arith.constant 0 : index
      %c0_13 = arith.constant 0 : index
      %23 = vector.load %arg9[%c0_12, %c0_13] : memref<64x32xf32, #tpu.memory_space<vmem>>, vector<64x32xf32>
      tpu.vector_store %arg9[%c0_12, %c0_13], %22 {strides = array<i32>} : memref<64x32xf32, #tpu.memory_space<vmem>>, vector<64x32xf32>,
    } else {
    }
    %c0 = arith.constant 0 : index
    %c0_1 = arith.constant 0 : index
    %c0_2 = arith.constant 0 : index
    %3 = vector.load %arg2[%c0, %c0_1, %c0_2] : memref<8x8x1xi32, #tpu.memory_space<vmem>>, vector<8x8x1xi32>
    %4 = vector.shape_cast %3 : vector<8x8x1xi32> to vector<64x1xi32>
    %c64_i32 = arith.constant 64 : i32
    %5 = arith.muli %arg1, %c64_i32 : i32
    %6 = vector.broadcast %5 : i32 to vector<64x1xi32>
    %7 = arith.subi %4, %6 : vector<64x1xi32>
    %8 = tpu.iota {dimensions = array<i32: 1>} : vector<64x64xi32>
    %9 = vector.broadcast %7 : vector<64x1xi32> to vector<64x64xi32>
    %10 = arith.cmpi eq, %8, %9 : vector<64x64xi32>
    %11 = arith.extui %10 : vector<64x64xi1> to vector<64x64xi32>
    %12 = arith.sitofp %11 : vector<64x64xi32> to vector<64x64xf32>
    %13 = arith.truncf %12 : vector<64x64xf32> to vector<64x64xbf16>
    %c0_3 = arith.constant 0 : index
    %c0_4 = arith.constant 0 : index
    %14 = vector.load %arg9[%c0_3, %c0_4] : memref<64x32xf32, #tpu.memory_space<vmem>>, vector<64x32xf32>
    %c0_5 = arith.constant 0 : index
    %c0_6 = arith.constant 0 : index
    %15 = vector.load %arg3[%c0_5, %c0_6] : memref<64x32xbf16, #tpu.memory_space<vmem>>, vector<64x32xbf16>
    %cst = arith.constant dense<0.000000e+00> : vector<64x32xf32>
    %16 = tpu.matmul %13, %15, %cst {dimension_numbers = #tpu.dot_dimension_numbers<[1], [0], [0], [1], [0, 0, 1, 1], [], []>} : vector<64x64xbf16>, vector<64x32xbf16>, vector<64x32xf32> -> vector<64x32xf32>
    %17 = arith.addf %14, %16 : vector<64x32xf32>
    %c0_7 = arith.constant 0 : index
    %c0_8 = arith.constant 0 : index
    %18 = vector.load %arg9[%c0_7, %c0_8] : memref<64x32xf32, #tpu.memory_space<vmem>>, vector<64x32xf32>
    tpu.vector_store %arg9[%c0_7, %c0_8], %17 {strides = array<i32>} : memref<64x32xf32, #tpu.memory_space<vmem>>, vector<64x32xf32>,
    %c0_i32_9 = arith.constant 0 : i32
    %19 = arith.cmpi eq, %arg1, %c0_i32_9 : i32
    %20 = arith.extui %19 : i1 to i32
    %c0_i32_10 = arith.constant 0 : i32
    %21 = arith.cmpi ne, %20, %c0_i32_10 : i32
    scf.if %21 {
      %c0_11 = arith.constant 0 : index
      %c0_12 = arith.constant 0 : index
      %22 = vector.load %arg9[%c0_11, %c0_12] : memref<64x32xf32, #tpu.memory_space<vmem>>, vector<64x32xf32>
      %23 = vector.shape_cast %22 : vector<64x32xf32> to vector<8x8x32xf32>
      %cst_13 = arith.constant dense<0.000000e+00> : vector<8x32xf32>
      %24 = vector.multi_reduction <add>, %23, %cst_13 [0] : vector<8x8x32xf32> to vector<8x32xf32>
      %cst_14 = arith.constant 1.250000e-01 : f32
      %25 = vector.broadcast %cst_14 : f32 to vector<8x32xf32>
      %26 = arith.mulf %24, %25 : vector<8x32xf32>
      %c0_15 = arith.constant 0 : index
      %c0_16 = arith.constant 0 : index
      %27 = vector.load %arg4[%c0_15, %c0_16] : memref<32x128xf32, #tpu.memory_space<vmem>>, vector<32x128xf32>
      %cst_17 = arith.constant dense<0.000000e+00> : vector<8x128xf32>
      %28 = tpu.matmul %26, %27, %cst_17 {dimension_numbers = #tpu.dot_dimension_numbers<[1], [0], [0], [1], [0, 0, 1, 1], [], []>} : vector<8x32xf32>, vector<32x128xf32>, vector<8x128xf32> -> vector<8x128xf32>
      %c0_18 = arith.constant 0 : index
      %c0_19 = arith.constant 0 : index
      %29 = vector.load %arg5[%c0_18, %c0_19] : memref<1x128xf32, #tpu.memory_space<vmem>>, vector<1x128xf32>
      %30 = vector.broadcast %29 : vector<1x128xf32> to vector<8x128xf32>
      %31 = arith.addf %28, %30 : vector<8x128xf32>
      %cst_20 = arith.constant 0.000000e+00 : f32
      %32 = vector.broadcast %cst_20 : f32 to vector<8x128xf32>
      %33 = arith.maximumf %31, %32 : vector<8x128xf32>
      %c0_21 = arith.constant 0 : index
      %c0_22 = arith.constant 0 : index
      %34 = vector.load %arg6[%c0_21, %c0_22] : memref<128x128xf32, #tpu.memory_space<vmem>>, vector<128x128xf32>
      %cst_23 = arith.constant dense<0.000000e+00> : vector<8x128xf32>
      %35 = tpu.matmul %33, %34, %cst_23 {dimension_numbers = #tpu.dot_dimension_numbers<[1], [0], [0], [1], [0, 0, 1, 1], [], []>} : vector<8x128xf32>, vector<128x128xf32>, vector<8x128xf32> -> vector<8x128xf32>
      %c0_24 = arith.constant 0 : index
      %c0_25 = arith.constant 0 : index
      %36 = vector.load %arg7[%c0_24, %c0_25] : memref<1x128xf32, #tpu.memory_space<vmem>>, vector<1x128xf32>
      %37 = vector.broadcast %36 : vector<1x128xf32> to vector<8x128xf32>
      %38 = arith.addf %35, %37 : vector<8x128xf32>
      %39 = arith.negf %38 : vector<8x128xf32>
      %40 = math.exp %39 : vector<8x128xf32>
      %cst_26 = arith.constant 1.000000e+00 : f32
      %41 = vector.broadcast %cst_26 : f32 to vector<8x128xf32>
      %42 = arith.addf %41, %40 : vector<8x128xf32>
      %43 = arith.divf %41, %42 : vector<8x128xf32>
      %c0_27 = arith.constant 0 : index
      %c0_28 = arith.constant 0 : index
      %44 = vector.load %arg8[%c0_27, %c0_28] : memref<8x128xf32, #tpu.memory_space<vmem>>, vector<8x128xf32>
      tpu.vector_store %arg8[%c0_27, %c0_28], %43 {strides = array<i32>} : memref<8x128xf32, #tpu.memory_space<vmem>>, vector<8x128xf32>,
    } else {
    }
    return
  }
  func.func @transform_0(%arg0: i32, %arg1: i32) -> (i32, i32, i32) {
    %c0_i32 = arith.constant 0 : i32
    %c0_i32_0 = arith.constant 0 : i32
    %c0_i32_1 = arith.constant 0 : i32
    return %c0_i32, %arg0, %c0_i32_0 : i32, i32, i32
  }
  func.func @transform_1(%arg0: i32, %arg1: i32) -> (i32, i32) {
    %c0_i32 = arith.constant 0 : i32
    %c0_i32_0 = arith.constant 0 : i32
    return %arg1, %c0_i32 : i32, i32
  }
  func.func @transform_2(%arg0: i32, %arg1: i32) -> (i32, i32) {
    %c0_i32 = arith.constant 0 : i32
    %c0_i32_0 = arith.constant 0 : i32
    %c0_i32_1 = arith.constant 0 : i32
    return %c0_i32, %c0_i32_0 : i32, i32
  }
  func.func @transform_3(%arg0: i32, %arg1: i32) -> (i32, i32) {
    %c0_i32 = arith.constant 0 : i32
    %c0_i32_0 = arith.constant 0 : i32
    %c0_i32_1 = arith.constant 0 : i32
    return %c0_i32, %c0_i32_0 : i32, i32
  }
  func.func @transform_4(%arg0: i32, %arg1: i32) -> (i32, i32) {
    %c0_i32 = arith.constant 0 : i32
    %c0_i32_0 = arith.constant 0 : i32
    %c0_i32_1 = arith.constant 0 : i32
    return %c0_i32, %c0_i32_0 : i32, i32
  }
  func.func @transform_5(%arg0: i32, %arg1: i32) -> (i32, i32) {
    %c0_i32 = arith.constant 0 : i32
    %c0_i32_0 = arith.constant 0 : i32
    %c0_i32_1 = arith.constant 0 : i32
    return %c0_i32, %c0_i32_0 : i32, i32
  }
  func.func @transform_6(%arg0: i32, %arg1: i32) -> (i32, i32) {
    %c0_i32 = arith.constant 0 : i32
    %c0_i32_0 = arith.constant 0 : i32
    return %arg0, %c0_i32 : i32, i32
  }
}

</mosaic_0001>

<bundles_post_ra>
// kernel: tpu_custom_call.1
= control target key start
LH: loop header
LB: loop body
LE: loop exit
PB: predicated region body
PF: predicated region fallthrough
CT: control target
= control target key end

     0   :  { %11 = vsyncpa [#allocation4], 0  ;;  %s828_s0 = inlined_call_operand.vmem [shape: s32[8,8,1], index: 0, kind: input, shape index: {}]   ;;  %s829_s1 = inlined_call_operand.vmem [shape: bf16[64,32], index: 1, kind: input, shape index: {}]   ;;  %s830_s2 = inlined_call_operand.vmem [shape: f32[32,128], index: 2, kind: input, shape index: {}]   ;;  %s831_s3 = inlined_call_operand.vmem [shape: f32[1,128], index: 3, kind: input, shape index: {}]   ;;  %s832_s4 = inlined_call_operand.hbm [shape: f32[128,128], index: 4, kind: input, shape index: {}]   ;;  %s833_s5 = inlined_call_operand.vmem [shape: f32[1,128], index: 5, kind: input, shape index: {}]   ;;  %s834_s6 = inlined_call_operand.hbm [shape: f32[8,128], index: 6, kind: output, shape index: {}]  }
   0x1   :  { %12 = vsyncpa [#allocation5], 0  ;;  %s659_s21 = smov [#allocation3]  }
   0x2   :  { %s26_s22 = sshll.u32 %s659_s21, 4  ;;  %s27_s22 = int_to_ptr.vmem [resolvable:$true] %s26_s22 }
   0x3   :  { %s623_s23 = scalar_lea.vmem %s27_s22, 2048  ;;  %p628_p1 = scmp.lt.s32.totalorder %s27_s22, %s27_s22 }
   0x4   :  { %p624_p0 = scmp.ne.s32.totalorder %s27_s22, %s623_s23  ;;  %p629_p2 = scmp.lt.s32.totalorder %s623_s23, %s623_s23 }
   0x6   :  { %p630_p3 = por %p629_p2, %p628_p1 }
   0x8   :  { %p631_p4 = pnand %p630_p3, %p624_p0 }
   0xa   :  { %634 = shalt.err (!%p631_p4)
}
   0xb   :  { %s660_s24 = smov 128   ;;  %s661_s25 = smov 8  }
   0xc   :  { %32 = dma.hbm_to_vmem [thread:$0]  %s832_s4, 2048, %s27_s22, [#allocation4], %s660_s24, %s660_s24, %s661_s25  }
   0xd   :  { %655 = dma.done.wait [#allocation4], 2048  }
   0xe   :  { %656 = vsyncadd [#allocation4], 4294965248  ;;  %v662_v0 = vmov 0   ;;  %v663_v1 = vmov 0.0   ;;  %v54_v2 = vld [vmem:[%s828_s0 + $0x10] sm:$0xff]  ;;  %v52_v3 = vld [vmem:[%s828_s0] sm:$0xff]  ;;  %v70_v14 = vlaneseq }
   0xf   :  { %606 = vset.pattern.permute.xlu1 %v662_v0  ;;  %605 = vset.pattern.permute.xlu0 %v662_v0  ;;  %v55_v4 = vld [vmem:[%s828_s0 + $0x18] sm:$0xff]  ;;  %v53_v5 = vld [vmem:[%s828_s0 + $0x8] sm:$0xff]  ;;  %v608_v7 = vld [vmem:[%s829_s1 + $0x10] sm:$0xff]   ;;  %vm43_vm0 = vcmask 261120   ;;  %vm164_vm5 = vcmask 523264   ;;  %vm664_vm10 = vmmov 0  }
  0x10   :  { %563 = vmatprep.subr.mxu1 %v663_v1  ;;  %79 = vperm.xlu1 %606, %v54_v2   ;;  %v607_v6 = vld [vmem:[%s829_s1 + $0x18] sm:$0xff]   ;;  %v57_v8 = vld [vmem:[%s828_s0 + $0x28] sm:$0xff]  ;;  %v56_v9 = vld [vmem:[%s828_s0 + $0x20] sm:$0xff]  ;;  %46 = vst.msk [vmem:[#allocation2 + $0x10] sm:$0xff] %vm43_vm0, %v663_v1  ;;  %v71_v15 = vand.u32 127, %v70_v14  ;;  %s665_s11 = smov [#allocation6]  }
  0x11   :  { %73 = vperm.xlu0 %605, %v52_v3   ;;  %536 = vmatprep.subr.bf16.mxu0 %v607_v6  ;;  %v609_v10 = vld [vmem:[%s829_s1 + $0x8] sm:$0xff]   ;;  %v59_v11 = vld [vmem:[%s828_s0 + $0x38] sm:$0xff]  ;;  %v58_v12 = vld [vmem:[%s828_s0 + $0x30] sm:$0xff]  ;;  %44 = vst.msk [vmem:[#allocation2] sm:$0xff] %vm43_vm0, %v663_v1  ;;  %s477_s12 = sshll.u32 %s665_s11, 4  ;;  %s478_s12 = int_to_ptr.vmem [resolvable:$true] %s477_s12 }
  0x12   :  { %537 = vmatpush3.bf16.msra.mxu0 %v607_v6  ;;  %v610_v13 = vld [vmem:[%s829_s1] sm:$0xff]   ;;  %45 = vst.msk [vmem:[#allocation2 + $0x8] sm:$0xff] %vm43_vm0, %v663_v1  ;;  %47 = vst.msk [vmem:[#allocation2 + $0x18] sm:$0xff] %vm43_vm0, %v663_v1  ;;  %v289_v36 = vld [vmem:[%s830_s2 + $0x18] sm:$0xff]  ;;  %595 = vmatprep.mubr.msk.f32.mxu1 %vm664_vm10, %v663_v1  ;;  %p640_p6 = scmp.lt.s32.totalorder %s478_s12, %s478_s12 }
  0x13   :  { %538 = vmatprep.subr.bf16.mxu0 %v608_v7  ;;  %48 = vst.msk [vmem:[#allocation2 + $0x20] sm:$0xff] %vm43_vm0, %v663_v1  ;;  %49 = vst.msk [vmem:[#allocation2 + $0x28] sm:$0xff] %vm43_vm0, %v663_v1  ;;  %v288_v37 = vld [vmem:[%s830_s2 + $0x10] sm:$0xff]  ;;  %v287_v38 = vld [vmem:[%s830_s2 + $0x8] sm:$0xff] }
  0x14   :  { %82 = vperm.xlu1 %606, %v55_v4   ;;  %50 = vst.msk [vmem:[#allocation2 + $0x30] sm:$0xff] %vm43_vm0, %v663_v1  ;;  %51 = vst.msk [vmem:[#allocation2 + $0x38] sm:$0xff] %vm43_vm0, %v663_v1  ;;  %v286_v39 = vld [vmem:[%s830_s2] sm:$0xff]  ;;  %v386_v40 = vld [vmem:[#allocation3 + $0x78] sm:$0xff] }
  0x15   :  { %76 = vperm.xlu0 %605, %v53_v5   ;;  %v385_v41 = vld [vmem:[#allocation3 + $0x70] sm:$0xff]  ;;  %564 = vmatpush3.msra.mxu1 %v386_v40  ;;  %v384_v42 = vld [vmem:[#allocation3 + $0x68] sm:$0xff]  ;;  %v383_v43 = vld [vmem:[#allocation3 + $0x60] sm:$0xff] }
  0x16   :  { %539 = vmatpush3.bf16.msra.mxu0 %v608_v7  ;;  %565 = vmatprep.subr.mxu1 %v663_v1  ;;  %v382_v44 = vld [vmem:[#allocation3 + $0x58] sm:$0xff]  ;;  %v381_v45 = vld [vmem:[#allocation3 + $0x50] sm:$0xff]  ;;  %v380_v46 = vld [vmem:[#allocation3 + $0x48] sm:$0xff] }
  0x17   :  { %540 = vmatprep.subr.bf16.mxu0 %v609_v10  ;;  %566 = vmatpush3.msra.mxu1 %v385_v41  ;;  %v379_v47 = vld [vmem:[#allocation3 + $0x40] sm:$0xff]  ;;  %v378_v48 = vld [vmem:[#allocation3 + $0x38] sm:$0xff]  ;;  %v377_v49 = vld [vmem:[#allocation3 + $0x30] sm:$0xff] }
  0x18   :  { %88 = vperm.xlu1 %606, %v57_v8   ;;  %567 = vmatprep.subr.mxu1 %v663_v1  ;;  %v376_v50 = vld [vmem:[#allocation3 + $0x28] sm:$0xff]  ;;  %v375_v51 = vld [vmem:[#allocation3 + $0x20] sm:$0xff]  ;;  %v374_v52 = vld [vmem:[#allocation3 + $0x18] sm:$0xff] }
  0x19   :  { %85 = vperm.xlu0 %605, %v56_v9   ;;  %568 = vmatpush3.msra.mxu1 %v384_v42  ;;  %v126_v53 = vld [vmem:[#allocation2 + $0x10] sm:$0xff]  ;;  %v124_v55 = vld [vmem:[#allocation2] sm:$0xff]  ;;  %v127_v58 = vld [vmem:[#allocation2 + $0x18] sm:$0xff] }
  0x1a   :  { %541 = vmatpush3.bf16.msra.mxu0 %v609_v10  ;;  %569 = vmatprep.subr.mxu1 %v663_v1  ;;  %v125_v61 = vld [vmem:[#allocation2 + $0x8] sm:$0xff]  ;;  %v128_v4 = vld [vmem:[#allocation2 + $0x20] sm:$0xff] }
  0x1b   :  { %542 = vmatprep.subr.bf16.mxu0 %v610_v13  ;;  %570 = vmatpush3.msra.mxu1 %v383_v43  ;;  %v130_v0 = vld [vmem:[#allocation2 + $0x30] sm:$0xff]  ;;  %v131_v7 = vld [vmem:[#allocation2 + $0x38] sm:$0xff]  ;;  %v129_v10 = vld [vmem:[#allocation2 + $0x28] sm:$0xff] }
  0x1c   :  { %94 = vperm.xlu1 %606, %v59_v11   ;;  %571 = vmatprep.subr.mxu1 %v663_v1  ;;  %v371_v40 = vld [vmem:[#allocation3] sm:$0xff] }
  0x1d   :  { %91 = vperm.xlu0 %605, %v58_v12   ;;  %572 = vmatpush3.msra.mxu1 %v382_v44  ;;  %v502_v41 = vld [vmem:[%s831_s3] ss:$0 sm:$0xff]  ;;  %s635_s3 = scalar_lea.vmem %s478_s12, 128 }
  0x1e   :  { %543 = vmatpush3.bf16.msra.mxu0 %v610_v13  ;;  %573 = vmatprep.subr.mxu1 %v663_v1  ;;  %p636_p5 = scmp.ne.s32.totalorder %s478_s12, %s635_s3  ;;  %p641_p7 = scmp.lt.s32.totalorder %s635_s3, %s635_s3 }
  0x1f   :  { %552 = vmatprep.subr.mxu0 %v663_v1  ;;  %574 = vmatpush3.msra.mxu1 %v381_v45 }
  0x20   :  { %575 = vmatprep.subr.mxu1 %v663_v1  ;;  %p642_p8 = por %p641_p7, %p640_p6 }
  0x21   :  { %576 = vmatpush3.msra.mxu1 %v380_v46  ;;  %v504_v46 = vld [vmem:[%s833_s5] ss:$0 sm:$0xff] }
  0x22   :  { %577 = vmatprep.subr.mxu1 %v663_v1  ;;  %p643_p9 = pnand %p642_p8, %p636_p5 }
  0x23   :  { %578 = vmatpush3.msra.mxu1 %v379_v47 }
  0x24   :  { %579 = vmatprep.subr.mxu1 %v663_v1 }
  0x25   :  { %580 = vmatpush3.msra.mxu1 %v378_v48 }
  0x26   :  { %581 = vmatprep.subr.mxu1 %v663_v1 }
  0x27   :  { %582 = vmatpush3.msra.mxu1 %v377_v49 }
  0x28   :  { %583 = vmatprep.subr.mxu1 %v663_v1 }
  0x29   :  { %584 = vmatpush3.msra.mxu1 %v376_v50 }
  0x2a   :  { %585 = vmatprep.subr.mxu1 %v663_v1 }
  0x2b   :  { %586 = vmatpush3.msra.mxu1 %v375_v51 }
  0x2c   :  { %587 = vmatprep.subr.mxu1 %v663_v1 }
  0x2d   :  { %588 = vmatpush3.msra.mxu1 %v374_v52 }
  0x2e   :  { %589 = vmatprep.subr.mxu1 %v663_v1 }
  0x8b   :  { %v80_v16 = vpop.permute.xlu1 %79 }
  0x8c   :  { %v74_v17 = vpop.permute.xlu0 %73  ;;  %vm98_vm1 = vcmp.eq.s32.totalorder %v71_v15, %v80_v16 }
  0x8d   :  { %vm96_vm2 = vcmp.eq.s32.totalorder %v71_v15, %v74_v17  ;;  %v488_v20 = vsel %vm98_vm1, 1.0, %v663_v1 }
  0x8e   :  { %v486_v21 = vsel %vm96_vm2, 1.0, %v663_v1 }
  0x8f   :  { %v83_v18 = vpop.permute.xlu1 %82 }
  0x90   :  { %v77_v19 = vpop.permute.xlu0 %76  ;;  %vm99_vm3 = vcmp.eq.s32.totalorder %v71_v15, %v83_v18 }
  0x91   :  { %vm97_vm4 = vcmp.eq.s32.totalorder %v71_v15, %v77_v19  ;;  %v489_v22 = vsel %vm99_vm3, 1.0, %v663_v1 }
  0x92   :  { %v487_v23 = vsel %vm97_vm4, 1.0, %v663_v1  ;;  %v121_v24 = vpack.c.bf16 %v489_v22, %v488_v20 }
  0x93   :  { %v120_v25 = vpack.c.bf16 %v487_v23, %v486_v21  ;;  %v89_v26 = vpop.permute.xlu1 %88 }
  0x94   :  { %v86_v27 = vpop.permute.xlu0 %85  ;;  %vm101_vm6 = vcmp.eq.s32.totalorder %v71_v15, %v89_v26 }
  0x95   :  { %vm100_vm7 = vcmp.eq.s32.totalorder %v71_v15, %v86_v27  ;;  %544 = vmatprep.mubr.msk.bf16.mxu0 %vm164_vm5, %v120_v25  ;;  %v491_v28 = vsel %vm101_vm6, 1.0, %v663_v1 }
  0x96   :  { %v490_v29 = vsel %vm100_vm7, 1.0, %v663_v1  ;;  %545 = vmatmul.mubr.msk.bf16.vlgmr.msra.gmra.mxu0 %vm164_vm5, %v121_v24 }
  0x97   :  { %v122_v30 = vpack.c.bf16 %v491_v28, %v490_v29  ;;  %v95_v31 = vpop.permute.xlu1 %94  ;;  %553 = vmatpush3.msra.mxu0 %v289_v36 }
  0x98   :  { %v92_v32 = vpop.permute.xlu0 %91  ;;  %vm103_vm8 = vcmp.eq.s32.totalorder %v71_v15, %v95_v31  ;;  %554 = vmatprep.subr.mxu0 %v663_v1 }
  0x99   :  { %vm102_vm9 = vcmp.eq.s32.totalorder %v71_v15, %v92_v32  ;;  %548 = vmatprep.mubr.msk.bf16.mxu0 %vm164_vm5, %v122_v30  ;;  %v493_v33 = vsel %vm103_vm8, 1.0, %v663_v1  ;;  %555 = vmatpush3.msra.mxu0 %v288_v37 }
  0x9a   :  { %v492_v34 = vsel %vm102_vm9, 1.0, %v663_v1  ;;  %556 = vmatprep.subr.mxu0 %v663_v1 }
  0x9b   :  { %v123_v35 = vpack.c.bf16 %v493_v33, %v492_v34  ;;  %557 = vmatpush3.msra.mxu0 %v287_v38  ;;  %v373_v38 = vld [vmem:[#allocation3 + $0x10] sm:$0xff] }
  0x9c   :  { %558 = vmatprep.subr.mxu0 %v663_v1  ;;  %590 = vmatpush3.msra.mxu1 %v373_v38 }
  0x9d   :  { %559 = vmatpush3.msra.mxu0 %v286_v39  ;;  %591 = vmatprep.subr.mxu1 %v663_v1  ;;  %v372_v39 = vld [vmem:[#allocation3 + $0x8] sm:$0xff] }
  0x9e   :  { %549 = vmatmul.mubr.msk.bf16.gmra.mxu0 %vm164_vm5, %v123_v35  ;;  %592 = vmatpush3.msra.mxu1 %v372_v39 }
  0x9f   :  { %560 = vmatprep.mubr.msk.f32.mxu0 %vm664_vm10, %v663_v1  ;;  %593 = vmatprep.subr.mxu1 %v663_v1 }
  0xa0   :  { %594 = vmatpush3.msra.mxu1 %v371_v40 }
 0x156   :  { %v546_v54 = vpop.f32.mrf.mxu0 }
 0x157   :  { %v244_v56 = vadd.f32 %v546_v54, %v126_v53 }
 0x158   :  { %v211_v57 = vpop.f32.mrf.mxu0 }
 0x159   :  { %253 = vst.msk [vmem:[#allocation2 + $0x10] sm:$0xff] %vm43_vm0, %v244_v56  ;;  %v242_v59 = vadd.f32 %v211_v57, %v124_v55 }
 0x15a   :  { %v547_v60 = vpop.f32.mrf.mxu0 }
 0x15b   :  { %251 = vst.msk [vmem:[#allocation2] sm:$0xff] %vm43_vm0, %v242_v59  ;;  %v245_v62 = vadd.f32 %v547_v60, %v127_v58 }
 0x15c   :  { %v214_v63 = vpop.f32.mrf.mxu0 }
 0x15d   :  { %254 = vst.msk [vmem:[#allocation2 + $0x18] sm:$0xff] %vm43_vm0, %v245_v62  ;;  %v243_v2 = vadd.f32 %v214_v63, %v125_v61 }
 0x15e   :  { %v550_v3 = vpop.f32.mrf.mxu0 }
 0x15f   :  { %252 = vst.msk [vmem:[#allocation2 + $0x8] sm:$0xff] %vm43_vm0, %v243_v2  ;;  %v248_v5 = vadd.f32 %v550_v3, %v130_v0 }
 0x160   :  { %v227_v6 = vpop.f32.mrf.mxu0  ;;  %v264_v16 = vld [vmem:[#allocation2 + $0x10] sm:$0xff] }
 0x161   :  { %257 = vst.msk [vmem:[#allocation2 + $0x30] sm:$0xff] %vm43_vm0, %v248_v5  ;;  %v246_v8 = vadd.f32 %v227_v6, %v128_v4  ;;  %v273_v21 = vsel %vm43_vm0, %v264_v16, 0.0 }
 0x162   :  { %v551_v9 = vpop.f32.mrf.mxu0  ;;  %v262_v13 = vld [vmem:[#allocation2] sm:$0xff] }
 0x163   :  { %255 = vst.msk [vmem:[#allocation2 + $0x20] sm:$0xff] %vm43_vm0, %v246_v8  ;;  %v249_v11 = vadd.f32 %v551_v9, %v131_v7  ;;  %v270_v17 = vsel %vm43_vm0, %v262_v13, 0.0 }
 0x164   :  { %v230_v12 = vpop.f32.mrf.mxu0  ;;  %v265_v19 = vld [vmem:[#allocation2 + $0x18] sm:$0xff] }
 0x165   :  { %258 = vst.msk [vmem:[#allocation2 + $0x38] sm:$0xff] %vm43_vm0, %v249_v11  ;;  %v247_v14 = vadd.f32 %v230_v12, %v129_v10  ;;  %v275_v24 = vsel %vm43_vm0, %v265_v19, 0.0 }
 0x166   :  { %v263_v15 = vld [vmem:[#allocation2 + $0x8] sm:$0xff] }
 0x167   :  { %256 = vst.msk [vmem:[#allocation2 + $0x28] sm:$0xff] %vm43_vm0, %v247_v14  ;;  %v271_v18 = vsel %vm43_vm0, %v263_v15, 0.0 }
 0x168   :  { %v272_v20 = vadd.f32 %v271_v18, %v270_v17  ;;  %v268_v28 = vld [vmem:[#allocation2 + $0x30] sm:$0xff] }
 0x169   :  { %v281_v33 = vsel %vm43_vm0, %v268_v28, 0.0 }
 0x16a   :  { %v266_v22 = vld [vmem:[#allocation2 + $0x20] sm:$0xff]  ;;  %v274_v23 = vadd.f32 %v273_v21, %v272_v20 }
 0x16b   :  { %v277_v26 = vsel %vm43_vm0, %v266_v22, 0.0 }
 0x16c   :  { %v276_v25 = vadd.f32 %v275_v24, %v274_v23  ;;  %v269_v31 = vld [vmem:[#allocation2 + $0x38] sm:$0xff] }
 0x16d   :  { %v283_v35 = vsel %vm43_vm0, %v269_v31, 0.0 }
 0x16e   :  { %v267_v27 = vld [vmem:[#allocation2 + $0x28] sm:$0xff]  ;;  %v278_v29 = vadd.f32 %v277_v26, %v276_v25 }
 0x16f   :  { %v279_v30 = vsel %vm43_vm0, %v267_v27, 0.0 }
 0x170   :  { %v280_v32 = vadd.f32 %v279_v30, %v278_v29 }
 0x172   :  { %v282_v34 = vadd.f32 %v281_v33, %v280_v32 }
 0x174   :  { %v284_v36 = vadd.f32 %v283_v35, %v282_v34 }
 0x176   :  { %v285_v37 = vmul.f32 0.125, %v284_v36 }
 0x178   :  { %561 = vmatmul.mubr.msk.f32.vlgmr.msra.gmra.mxu0 %vm43_vm0, %v285_v37 }
 0x238   :  { %v366_v42 = vpop.f32.mrf.mxu0 }
 0x239   :  { %v367_v43 = vadd.f32 %v502_v41, %v366_v42 }
 0x23a   :  { %v562_v44 = vpop.f32.mrf.mxu0 }
 0x23b   :  { %v370_v45 = vmax.f32 %v367_v43, 0.0 }
 0x23d   :  { %596 = vmatmul.mubr.f32.vlgmr.msra.gmra.mxu1 %v370_v45 }
 0x2fd   :  { %v460_v47 = vpop.f32.mrf.mxu1 }
 0x2fe   :  { %v461_v48 = vadd.f32 %v504_v46, %v460_v47 }
 0x2ff   :  { %v597_v49 = vpop.f32.mrf.mxu1 }
 0x300   :  { %v505_v50 = vmul.f32 -1.442695, %v461_v48 }
 0x302   :  { %611 = vpow2.f32 %v505_v50 }
 0x30f   :  { %v612_v1 = vpop.eup %611 }
 0x310   :  { %v467_v51 = vadd.f32 1.0, %v612_v1 }
 0x312   :  { %613 = vrcp.f32 %v467_v51 }
 0x31f   :  { %v614_v52 = vpop.eup %613 }
 0x320   :  { %470 = vst [vmem:[#allocation6] sm:$0xff] %v614_v52 }
 0x321   :  { %646 = shalt.err (!%p643_p9)
}
 0x322   :  { %480 = dma.vmem_to_hbm [thread:$0]  %s478_s12, 128, %s834_s6, [#allocation5]  }
 0x323   :  { %657 = dma.done.wait [#allocation5], 128  }
 0x324   :  { %658 = vsyncadd [#allocation5], 4294967168 }
 0x325   :  { %484 = vsyncpa [#allocation4], 1 }
 0x326   :  { %485 = vsyncpa [#allocation5], 1 }

</bundles_post_ra>
